<compile_context>
chip_gen: v7x
topology: tpu7x:2x2x1
jax: 0.10.0
libtpu: 0.0.40
codegen_flags: <defaults>
</compile_context>

<pallas_src>
import math
import functools

import jax
import jax.numpy as jnp
from jax import lax
from jax.experimental import pallas as pl
from jax.experimental.pallas import tpu as pltpu


def mha_kernel(q_in_ref, k_in_ref, v_in_ref, mask_ref,
               wq_ref, bq_ref, wk_ref, bk_ref, wv_ref, bv_ref,
               wd_ref, bd_ref, gamma_ref, beta_ref,
               o_ref,
               *, n_heads, head_size, eps):
    # Per-grid-step refs:
    #   q_in (Bt, Sq, Hq) bf16, k_in/v_in (Bt, Sk, Hkv) bf16
    #   mask (Bt, mh, mq, Sk) f32   (mh in {1, n_heads}, mq in {1, Sq})
    #   wq (Hq, A) bf16 (pre-scaled by 1/sqrt(d)), wk/wv (Hkv, A) bf16, wd (A, Hq) bf16
    #   bq (1, A) f32 (pre-scaled), bk/bv (1, A) f32, bd/gamma/beta (1, Hq) f32
    Bt, Sq, Hq = q_in_ref.shape
    _, Sk, Hkv = k_in_ref.shape
    A = n_heads * head_size
    mh = mask_ref.shape[1]

    # --- Q/K/V projections on flattened (Bt*S, H) row blocks: fills MXU sublanes,
    #     bf16 operands (already bf16 from HBM), f32 accumulation + f32 bias add.
    q2 = q_in_ref[...].reshape(Bt * Sq, Hq)
    k2 = k_in_ref[...].reshape(Bt * Sk, Hkv)
    v2 = v_in_ref[...].reshape(Bt * Sk, Hkv)
    q = jnp.dot(q2, wq_ref[...], preferred_element_type=jnp.float32) + bq_ref[...]
    k = jnp.dot(k2, wk_ref[...], preferred_element_type=jnp.float32) + bk_ref[...]
    v = jnp.dot(v2, wv_ref[...], preferred_element_type=jnp.float32) + bv_ref[...]

    # back to (Bt, S, A) and single bf16 cast (no per-head casts)
    q3 = q.reshape(Bt, Sq, A).astype(jnp.bfloat16)
    k3 = k.reshape(Bt, Sk, A).astype(jnp.bfloat16)
    v3 = v.reshape(Bt, Sk, A).astype(jnp.bfloat16)

    mask = mask_ref[...]                               # (Bt, mh, mq, Sk) f32

    # --- per-head attention, batched over Bt with leading-batch 3-D einsums.
    # Head contexts are concatenated in vregs (no VMEM scratch, no masked stores).
    ctx_heads = []
    for h in range(n_heads):                           # static, small unroll
        lo, hi = h * head_size, (h + 1) * head_size
        qh = q3[:, :, lo:hi]                           # (Bt, Sq, d) (scale folded into Wq)
        kh = k3[:, :, lo:hi]                           # (Bt, Sk, d)
        vh = v3[:, :, lo:hi]                           # (Bt, Sk, d)

        scores = jnp.einsum('bqd,bkd->bqk', qh, kh,
                            preferred_element_type=jnp.float32)     # (Bt, Sq, Sk)
        scores = scores + mask[:, h % mh]              # additive mask, in-kernel broadcast

        # softmax over keys in f32 (exp on the EUP slot)
        m = jnp.max(scores, axis=-1, keepdims=True)
        e = jnp.exp(scores - m)
        probs = e / jnp.sum(e, axis=-1, keepdims=True)
        # TODO(synk): attn_dropout is identity in eval/inference mode; training-mode RNG mask not implemented.

        ctx_heads.append(jnp.einsum('bqk,bkd->bqd', probs.astype(jnp.bfloat16), vh,
                                    preferred_element_type=jnp.float32))

    ctx = jnp.concatenate(ctx_heads, axis=-1) if n_heads > 1 else ctx_heads[0]
    ctx = ctx.reshape(Bt * Sq, A)                      # (h, d) concat order == PyTorch .view

    # --- output projection + residual(context) + LayerNorm ----------------------
    y = jnp.dot(ctx.astype(jnp.bfloat16), wd_ref[...],
                preferred_element_type=jnp.float32) + bd_ref[...]
    # TODO(synk): out_dropout is identity in eval/inference mode.
    z = y + ctx

    mean = jnp.mean(z, axis=-1, keepdims=True)
    c = z - mean                                       # two-pass variance (better precision)
    var = jnp.mean(c * c, axis=-1, keepdims=True)
    zn = c * lax.rsqrt(var + eps)
    out = zn * gamma_ref[...] + beta_ref[...]
    # NOTE: Hq < 128 lanes -> writeback uses masked stores; a lane-dense output slab
    # is only worth it if a bundle dump shows the vst path exposed at real shapes.
    o_ref[...] = out.reshape(Bt, Sq, Hq).astype(o_ref.dtype)


def _pick_batch_tile(B, Sq):
    """Fill the MXU sublane dim (~512 rows) while keeping >=2 (ideally >=8) grid steps."""
    target_rows = 512
    bt = max(1, min(B, target_rows // max(Sq, 1)))
    min_steps = 8 if B >= 8 else (2 if B >= 2 else 1)
    bt = min(bt, max(1, B // min_steps))
    while B % bt:                                      # make bt a divisor of B
        bt -= 1
    return max(bt, 1)


def multi_head_attention_2d(input_query, input_key, input_value, attention_mask,
                            wq, bq, wk, bk, wv, bv, wd, bd, gamma, beta,
                            *, n_heads, eps=1e-12, block_batch=None):
    B, Sq, Hq = input_query.shape
    _, Sk, Hkv = input_key.shape
    A = wq.shape[1]                    # all_head_size (== Hq in this module)
    head_size = A // n_heads
    out_dtype = input_query.dtype

    bt = block_batch if block_batch is not None else _pick_batch_tile(B, Sq)
    grid = (B // bt,)

    # Fold 1/sqrt(d) into the query projection; pre-cast matmul weights to bf16 ONCE.
    scale = 1.0 / math.sqrt(head_size)
    wq_b = (wq * scale).astype(jnp.bfloat16)
    bq_s = (bq * scale).astype(jnp.float32)
    wk_b = wk.astype(jnp.bfloat16)
    wv_b = wv.astype(jnp.bfloat16)
    wd_b = wd.astype(jnp.bfloat16)

    # Streamed activations in bf16 (halves HBM->VMEM DMA of the streamed operands).
    q_in = input_query.astype(jnp.bfloat16)
    k_in = input_key.astype(jnp.bfloat16)
    v_in = input_value.astype(jnp.bfloat16)

    # Do NOT materialize the (B, H, Sq, Sk) mask: only broadcast the batch dim.
    mask = jnp.asarray(attention_mask, jnp.float32)
    mask = jnp.broadcast_to(mask, (B,) + mask.shape[1:])
    _, mh, mq, mk = mask.shape

    kernel = functools.partial(mha_kernel, n_heads=n_heads,
                               head_size=head_size, eps=eps)
    const = lambda g: (0, 0)

    # Advisory cost estimate so XLA can schedule/overlap around the custom call.
    flops = int(2 * B * (Sq * Hq * A + 2 * Sk * Hkv * A
                         + 2 * n_heads * Sq * Sk * head_size
                         + Sq * A * Hq))
    transcendentals = int(B * n_heads * Sq * Sk + B * Sq)
    bytes_accessed = int(2 * (B * Sq * Hq + 2 * B * Sk * Hkv)           # bf16 activations
                         + 4 * B * mh * mq * mk                         # f32 mask
                         + 2 * (Hq * A + 2 * Hkv * A + A * Hq)          # bf16 weights
                         + 4 * (3 * A + 3 * Hq)                         # biases / LN params
                         + jnp.dtype(out_dtype).itemsize * B * Sq * Hq) # output

    out = pl.pallas_call(
        kernel,
        out_shape=jax.ShapeDtypeStruct((B, Sq, Hq), out_dtype),
        grid_spec=pltpu.PrefetchScalarGridSpec(
            num_scalar_prefetch=0,
            grid=grid,                                     # Bt batch elements per step
            in_specs=[
                pl.BlockSpec((bt, Sq, Hq), lambda g: (g, 0, 0)),        # query  (streamed bf16)
                pl.BlockSpec((bt, Sk, Hkv), lambda g: (g, 0, 0)),       # key    (streamed bf16)
                pl.BlockSpec((bt, Sk, Hkv), lambda g: (g, 0, 0)),       # value  (streamed bf16)
                pl.BlockSpec((bt, mh, mq, mk), lambda g: (g, 0, 0, 0)), # mask (un-broadcast, f32)
                pl.BlockSpec((Hq, A), const),    # Wq (bf16, scale folded) -- VMEM-resident
                pl.BlockSpec((1, A), const),     # bq (f32, scale folded)
                pl.BlockSpec((Hkv, A), const),   # Wk
                pl.BlockSpec((1, A), const),     # bk
                pl.BlockSpec((Hkv, A), const),   # Wv
                pl.BlockSpec((1, A), const),     # bv
                pl.BlockSpec((A, Hq), const),    # Wd
                pl.BlockSpec((1, Hq), const),    # bd
                pl.BlockSpec((1, Hq), const),    # gamma
                pl.BlockSpec((1, Hq), const),    # beta
            ],
            out_specs=pl.BlockSpec((bt, Sq, Hq), lambda g: (g, 0, 0)),
        ),
        compiler_params=pltpu.CompilerParams(
            dimension_semantics=("parallel",),             # batch tiles independent (v7x 2-TC shard)
            vmem_limit_bytes=48 * 1024 * 1024),            # > v5e 16MiB / v6e-v7x 32MiB defaults, < v7x 64MiB physical
        cost_estimate=pl.CostEstimate(flops=flops,
                                      transcendentals=transcendentals,
                                      bytes_accessed=bytes_accessed),
    )(q_in, k_in, v_in, mask,
      wq_b, bq_s, wk_b, bk, wv_b, bv, wd_b, bd, gamma, beta)
    return out


if __name__ == "__main__":
    # Module hyper-params (small): n_heads=2, hidden_size_q=hidden_size_kv=32,
    # attn/hidden dropout = 0.0 (inference), layer_norm_eps=1e-12
    B, Sq, Sk = 2, 8, 8
    n_heads, Hq, Hkv = 2, 32, 32
    A = Hq
    d = Hq // n_heads
    eps = 1e-12

    key = jax.random.PRNGKey(0)
    ks = jax.random.split(key, 11)

    input_query = jax.random.normal(ks[0], (B, Sq, Hq), jnp.float32)
    input_key = jax.random.normal(ks[1], (B, Sk, Hkv), jnp.float32)
    input_value = jax.random.normal(ks[2], (B, Sk, Hkv), jnp.float32)

    # additive attention mask (B, 1, 1, Sk): batch 1 masks out its last 3 key positions
    attention_mask = jnp.zeros((B, 1, 1, Sk), jnp.float32)
    attention_mask = attention_mask.at[1, 0, 0, Sk - 3:].set(-10000.0)

    def linear_init(kw, kb, fan_in, fan_out):
        bound = 1.0 / math.sqrt(fan_in)
        w = jax.random.uniform(kw, (fan_in, fan_out), jnp.float32, -bound, bound)
        b = jax.random.uniform(kb, (1, fan_out), jnp.float32, -bound, bound)
        return w, b

    wq, bq = linear_init(ks[3], ks[4], Hq, A)
    wk, bk = linear_init(ks[5], ks[6], Hkv, A)
    wv, bv = linear_init(ks[7], ks[8], Hkv, A)
    wd, bd = linear_init(ks[9], ks[10], A, Hq)
    gamma = jnp.ones((1, Hq), jnp.float32)
    beta = jnp.zeros((1, Hq), jnp.float32)

    out = multi_head_attention_2d(
        input_query, input_key, input_value, attention_mask,
        wq, bq, wk, bk, wv, bv, wd, bd, gamma, beta,
        n_heads=n_heads, eps=eps)
    jax.block_until_ready(out)

    # ---- plain-JAX reference mirroring the kernel's bf16-operand / f32-acc math ----
    def bdot(a, w):
        return jnp.dot(a.astype(jnp.bfloat16), w.astype(jnp.bfloat16),
                       preferred_element_type=jnp.float32)

    def ref():
        scale = 1.0 / math.sqrt(d)
        wq_s = (wq * scale).astype(jnp.bfloat16)
        bq_s = bq * scale
        q = bdot(input_query, wq_s) + bq_s[0]
        k = bdot(input_key, wk) + bk[0]
        v = bdot(input_value, wv) + bv[0]
        qh = q.reshape(B, Sq, n_heads, d).transpose(0, 2, 1, 3)
        kh = k.reshape(B, Sk, n_heads, d).transpose(0, 2, 1, 3)
        vh = v.reshape(B, Sk, n_heads, d).transpose(0, 2, 1, 3)
        scores = jnp.einsum('bhqd,bhkd->bhqk',
                            qh.astype(jnp.bfloat16), kh.astype(jnp.bfloat16),
                            preferred_element_type=jnp.float32)
        scores = scores + attention_mask
        probs = jax.nn.softmax(scores, axis=-1)
        ctx = jnp.einsum('bhqk,bhkd->bhqd',
                         probs.astype(jnp.bfloat16), vh.astype(jnp.bfloat16),
                         preferred_element_type=jnp.float32)
        ctx = ctx.transpose(0, 2, 1, 3).reshape(B, Sq, A)
        y = bdot(ctx, wd) + bd[0]
        z = y + ctx
        mu = z.mean(-1, keepdims=True)
        var = ((z - mu) ** 2).mean(-1, keepdims=True)
        return (z - mu) / jnp.sqrt(var + eps) * gamma[0] + beta[0]

    expected = ref()
    err = float(jnp.max(jnp.abs(out - expected)))
    assert jnp.allclose(out, expected, atol=1e-2, rtol=1e-2), err
    print("KERNEL_OK")
</pallas_src>

<mosaic_0001>
module attributes {stable_mosaic.version = 11 : i64} {
  func.func @mha_kernel(%arg0: i32, %arg1: memref<1x8x32xbf16, #tpu.memory_space<vmem>>, %arg2: memref<1x8x32xbf16, #tpu.memory_space<vmem>>, %arg3: memref<1x8x32xbf16, #tpu.memory_space<vmem>>, %arg4: memref<1x1x1x8xf32, #tpu.memory_space<vmem>>, %arg5: memref<32x32xbf16, #tpu.memory_space<vmem>>, %arg6: memref<1x32xf32, #tpu.memory_space<vmem>>, %arg7: memref<32x32xbf16, #tpu.memory_space<vmem>>, %arg8: memref<1x32xf32, #tpu.memory_space<vmem>>, %arg9: memref<32x32xbf16, #tpu.memory_space<vmem>>, %arg10: memref<1x32xf32, #tpu.memory_space<vmem>>, %arg11: memref<32x32xbf16, #tpu.memory_space<vmem>>, %arg12: memref<1x32xf32, #tpu.memory_space<vmem>>, %arg13: memref<1x32xf32, #tpu.memory_space<vmem>>, %arg14: memref<1x32xf32, #tpu.memory_space<vmem>>, %arg15: memref<1x8x32xf32, #tpu.memory_space<vmem>>) attributes {dimension_semantics = [#tpu.dimension_semantics<parallel>], iteration_bounds = array<i64: 2>, scalar_prefetch = 0 : i64, scratch_operands = 0 : i64, tpu.core_type = #tpu.core_type<tc>, window_params = [{transform_indices = @transform_0, window_bounds = array<i64: 1, 8, 32>}, {transform_indices = @transform_1, window_bounds = array<i64: 1, 8, 32>}, {transform_indices = @transform_2, window_bounds = array<i64: 1, 8, 32>}, {transform_indices = @transform_3, window_bounds = array<i64: 1, 1, 1, 8>}, {pipeline_mode = #tpu.pipeline_mode<synchronous>, transform_indices = @transform_4, window_bounds = array<i64: 32, 32>}, {pipeline_mode = #tpu.pipeline_mode<synchronous>, transform_indices = @transform_5, window_bounds = array<i64: 1, 32>}, {pipeline_mode = #tpu.pipeline_mode<synchronous>, transform_indices = @transform_6, window_bounds = array<i64: 32, 32>}, {pipeline_mode = #tpu.pipeline_mode<synchronous>, transform_indices = @transform_7, window_bounds = array<i64: 1, 32>}, {pipeline_mode = #tpu.pipeline_mode<synchronous>, transform_indices = @transform_8, window_bounds = array<i64: 32, 32>}, {pipeline_mode = #tpu.pipeline_mode<synchronous>, transform_indices = @transform_9, window_bounds = array<i64: 1, 32>}, {pipeline_mode = #tpu.pipeline_mode<synchronous>, transform_indices = @transform_10, window_bounds = array<i64: 32, 32>}, {pipeline_mode = #tpu.pipeline_mode<synchronous>, transform_indices = @transform_11, window_bounds = array<i64: 1, 32>}, {pipeline_mode = #tpu.pipeline_mode<synchronous>, transform_indices = @transform_12, window_bounds = array<i64: 1, 32>}, {pipeline_mode = #tpu.pipeline_mode<synchronous>, transform_indices = @transform_13, window_bounds = array<i64: 1, 32>}, {transform_indices = @transform_14, window_bounds = array<i64: 1, 8, 32>}]} {
    %c0 = arith.constant 0 : index
    %c0_0 = arith.constant 0 : index
    %c0_1 = arith.constant 0 : index
    %0 = vector.load %arg1[%c0, %c0_0, %c0_1] : memref<1x8x32xbf16, #tpu.memory_space<vmem>>, vector<1x8x32xbf16>
    %1 = vector.shape_cast %0 : vector<1x8x32xbf16> to vector<8x32xbf16>
    %c0_2 = arith.constant 0 : index
    %c0_3 = arith.constant 0 : index
    %c0_4 = arith.constant 0 : index
    %2 = vector.load %arg2[%c0_2, %c0_3, %c0_4] : memref<1x8x32xbf16, #tpu.memory_space<vmem>>, vector<1x8x32xbf16>
    %3 = vector.shape_cast %2 : vector<1x8x32xbf16> to vector<8x32xbf16>
    %c0_5 = arith.constant 0 : index
    %c0_6 = arith.constant 0 : index
    %c0_7 = arith.constant 0 : index
    %4 = vector.load %arg3[%c0_5, %c0_6, %c0_7] : memref<1x8x32xbf16, #tpu.memory_space<vmem>>, vector<1x8x32xbf16>
    %5 = vector.shape_cast %4 : vector<1x8x32xbf16> to vector<8x32xbf16>
    %c0_8 = arith.constant 0 : index
    %c0_9 = arith.constant 0 : index
    %6 = vector.load %arg5[%c0_8, %c0_9] : memref<32x32xbf16, #tpu.memory_space<vmem>>, vector<32x32xbf16>
    %cst = arith.constant dense<0.000000e+00> : vector<8x32xf32>
    %7 = tpu.matmul %1, %6, %cst {dimension_numbers = #tpu.dot_dimension_numbers<[1], [0], [0], [1], [0, 0, 1, 1], [], []>} : vector<8x32xbf16>, vector<32x32xbf16>, vector<8x32xf32> -> vector<8x32xf32>
    %c0_10 = arith.constant 0 : index
    %c0_11 = arith.constant 0 : index
    %8 = vector.load %arg6[%c0_10, %c0_11] : memref<1x32xf32, #tpu.memory_space<vmem>>, vector<1x32xf32>
    %9 = vector.broadcast %8 : vector<1x32xf32> to vector<8x32xf32>
    %10 = arith.addf %7, %9 : vector<8x32xf32>
    %c0_12 = arith.constant 0 : index
    %c0_13 = arith.constant 0 : index
    %11 = vector.load %arg7[%c0_12, %c0_13] : memref<32x32xbf16, #tpu.memory_space<vmem>>, vector<32x32xbf16>
    %cst_14 = arith.constant dense<0.000000e+00> : vector<8x32xf32>
    %12 = tpu.matmul %3, %11, %cst_14 {dimension_numbers = #tpu.dot_dimension_numbers<[1], [0], [0], [1], [0, 0, 1, 1], [], []>} : vector<8x32xbf16>, vector<32x32xbf16>, vector<8x32xf32> -> vector<8x32xf32>
    %c0_15 = arith.constant 0 : index
    %c0_16 = arith.constant 0 : index
    %13 = vector.load %arg8[%c0_15, %c0_16] : memref<1x32xf32, #tpu.memory_space<vmem>>, vector<1x32xf32>
    %14 = vector.broadcast %13 : vector<1x32xf32> to vector<8x32xf32>
    %15 = arith.addf %12, %14 : vector<8x32xf32>
    %c0_17 = arith.constant 0 : index
    %c0_18 = arith.constant 0 : index
    %16 = vector.load %arg9[%c0_17, %c0_18] : memref<32x32xbf16, #tpu.memory_space<vmem>>, vector<32x32xbf16>
    %cst_19 = arith.constant dense<0.000000e+00> : vector<8x32xf32>
    %17 = tpu.matmul %5, %16, %cst_19 {dimension_numbers = #tpu.dot_dimension_numbers<[1], [0], [0], [1], [0, 0, 1, 1], [], []>} : vector<8x32xbf16>, vector<32x32xbf16>, vector<8x32xf32> -> vector<8x32xf32>
    %c0_20 = arith.constant 0 : index
    %c0_21 = arith.constant 0 : index
    %18 = vector.load %arg10[%c0_20, %c0_21] : memref<1x32xf32, #tpu.memory_space<vmem>>, vector<1x32xf32>
    %19 = vector.broadcast %18 : vector<1x32xf32> to vector<8x32xf32>
    %20 = arith.addf %17, %19 : vector<8x32xf32>
    %21 = vector.shape_cast %10 : vector<8x32xf32> to vector<1x8x32xf32>
    %22 = arith.truncf %21 : vector<1x8x32xf32> to vector<1x8x32xbf16>
    %23 = vector.shape_cast %15 : vector<8x32xf32> to vector<1x8x32xf32>
    %24 = arith.truncf %23 : vector<1x8x32xf32> to vector<1x8x32xbf16>
    %25 = vector.shape_cast %20 : vector<8x32xf32> to vector<1x8x32xf32>
    %26 = arith.truncf %25 : vector<1x8x32xf32> to vector<1x8x32xbf16>
    %c0_22 = arith.constant 0 : index
    %c0_23 = arith.constant 0 : index
    %c0_24 = arith.constant 0 : index
    %c0_25 = arith.constant 0 : index
    %27 = vector.load %arg4[%c0_22, %c0_23, %c0_24, %c0_25] : memref<1x1x1x8xf32, #tpu.memory_space<vmem>>, vector<1x1x1x8xf32>
    %28 = vector.extract_strided_slice %22 {offsets = [0, 0, 0], sizes = [1, 8, 16], strides = [1, 1, 1]} : vector<1x8x32xbf16> to vector<1x8x16xbf16>
    %29 = vector.extract_strided_slice %24 {offsets = [0, 0, 0], sizes = [1, 8, 16], strides = [1, 1, 1]} : vector<1x8x32xbf16> to vector<1x8x16xbf16>
    %30 = vector.extract_strided_slice %26 {offsets = [0, 0, 0], sizes = [1, 8, 16], strides = [1, 1, 1]} : vector<1x8x32xbf16> to vector<1x8x16xbf16>
    "tpu.trace_start"() <{level = 10 : i32, message = "bqd,bkd->bqk"}> : () -> ()
    %cst_26 = arith.constant dense<0.000000e+00> : vector<1x8x8xf32>
    %31 = tpu.matmul %28, %29, %cst_26 {dimension_numbers = #tpu.dot_dimension_numbers<[2], [2], [1], [1], [0, 0, 0, 1, 1, 1], [0], [0]>} : vector<1x8x16xbf16>, vector<1x8x16xbf16>, vector<1x8x8xf32> -> vector<1x8x8xf32>
    "tpu.trace_stop"() : () -> ()
    %32 = vector.shape_cast %27 : vector<1x1x1x8xf32> to vector<1x1x8xf32>
    %33 = vector.broadcast %32 : vector<1x1x8xf32> to vector<1x8x8xf32>
    %34 = arith.addf %31, %33 : vector<1x8x8xf32>
    %cst_27 = arith.constant dense<0xFF800000> : vector<1x8xf32>
    %35 = vector.multi_reduction <maximumf>, %34, %cst_27 [2] : vector<1x8x8xf32> to vector<1x8xf32>
    %36 = vector.shape_cast %35 : vector<1x8xf32> to vector<1x8x1xf32>
    %37 = vector.broadcast %36 : vector<1x8x1xf32> to vector<1x8x8xf32>
    %38 = arith.subf %34, %37 : vector<1x8x8xf32>
    %39 = math.exp %38 : vector<1x8x8xf32>
    %cst_28 = arith.constant dense<0.000000e+00> : vector<1x8xf32>
    %40 = vector.multi_reduction <add>, %39, %cst_28 [2] : vector<1x8x8xf32> to vector<1x8xf32>
    %41 = vector.shape_cast %40 : vector<1x8xf32> to vector<1x8x1xf32>
    %42 = vector.broadcast %41 : vector<1x8x1xf32> to vector<1x8x8xf32>
    %43 = arith.divf %39, %42 : vector<1x8x8xf32>
    %44 = arith.truncf %43 : vector<1x8x8xf32> to vector<1x8x8xbf16>
    "tpu.trace_start"() <{level = 10 : i32, message = "bqk,bkd->bqd"}> : () -> ()
    %cst_29 = arith.constant dense<0.000000e+00> : vector<1x8x16xf32>
    %45 = tpu.matmul %44, %30, %cst_29 {dimension_numbers = #tpu.dot_dimension_numbers<[2], [1], [1], [2], [0, 0, 0, 1, 1, 2], [0], [0]>} : vector<1x8x8xbf16>, vector<1x8x16xbf16>, vector<1x8x16xf32> -> vector<1x8x16xf32>
    "tpu.trace_stop"() : () -> ()
    %46 = vector.extract_strided_slice %22 {offsets = [0, 0, 16], sizes = [1, 8, 16], strides = [1, 1, 1]} : vector<1x8x32xbf16> to vector<1x8x16xbf16>
    %47 = vector.extract_strided_slice %24 {offsets = [0, 0, 16], sizes = [1, 8, 16], strides = [1, 1, 1]} : vector<1x8x32xbf16> to vector<1x8x16xbf16>
    %48 = vector.extract_strided_slice %26 {offsets = [0, 0, 16], sizes = [1, 8, 16], strides = [1, 1, 1]} : vector<1x8x32xbf16> to vector<1x8x16xbf16>
    "tpu.trace_start"() <{level = 10 : i32, message = "bqd,bkd->bqk"}> : () -> ()
    %cst_30 = arith.constant dense<0.000000e+00> : vector<1x8x8xf32>
    %49 = tpu.matmul %46, %47, %cst_30 {dimension_numbers = #tpu.dot_dimension_numbers<[2], [2], [1], [1], [0, 0, 0, 1, 1, 1], [0], [0]>} : vector<1x8x16xbf16>, vector<1x8x16xbf16>, vector<1x8x8xf32> -> vector<1x8x8xf32>
    "tpu.trace_stop"() : () -> ()
    %50 = vector.shape_cast %27 : vector<1x1x1x8xf32> to vector<1x1x8xf32>
    %51 = vector.broadcast %50 : vector<1x1x8xf32> to vector<1x8x8xf32>
    %52 = arith.addf %49, %51 : vector<1x8x8xf32>
    %cst_31 = arith.constant dense<0xFF800000> : vector<1x8xf32>
    %53 = vector.multi_reduction <maximumf>, %52, %cst_31 [2] : vector<1x8x8xf32> to vector<1x8xf32>
    %54 = vector.shape_cast %53 : vector<1x8xf32> to vector<1x8x1xf32>
    %55 = vector.broadcast %54 : vector<1x8x1xf32> to vector<1x8x8xf32>
    %56 = arith.subf %52, %55 : vector<1x8x8xf32>
    %57 = math.exp %56 : vector<1x8x8xf32>
    %cst_32 = arith.constant dense<0.000000e+00> : vector<1x8xf32>
    %58 = vector.multi_reduction <add>, %57, %cst_32 [2] : vector<1x8x8xf32> to vector<1x8xf32>
    %59 = vector.shape_cast %58 : vector<1x8xf32> to vector<1x8x1xf32>
    %60 = vector.broadcast %59 : vector<1x8x1xf32> to vector<1x8x8xf32>
    %61 = arith.divf %57, %60 : vector<1x8x8xf32>
    %62 = arith.truncf %61 : vector<1x8x8xf32> to vector<1x8x8xbf16>
    "tpu.trace_start"() <{level = 10 : i32, message = "bqk,bkd->bqd"}> : () -> ()
    %cst_33 = arith.constant dense<0.000000e+00> : vector<1x8x16xf32>
    %63 = tpu.matmul %62, %48, %cst_33 {dimension_numbers = #tpu.dot_dimension_numbers<[2], [1], [1], [2], [0, 0, 0, 1, 1, 2], [0], [0]>} : vector<1x8x8xbf16>, vector<1x8x16xbf16>, vector<1x8x16xf32> -> vector<1x8x16xf32>
    "tpu.trace_stop"() : () -> ()
    %64 = tpu.concatenate %45, %63 in 2 : vector<1x8x16xf32>, vector<1x8x16xf32> -> vector<1x8x32xf32>
    %65 = vector.shape_cast %64 : vector<1x8x32xf32> to vector<8x32xf32>
    %66 = arith.truncf %65 : vector<8x32xf32> to vector<8x32xbf16>
    %c0_34 = arith.constant 0 : index
    %c0_35 = arith.constant 0 : index
    %67 = vector.load %arg11[%c0_34, %c0_35] : memref<32x32xbf16, #tpu.memory_space<vmem>>, vector<32x32xbf16>
    %cst_36 = arith.constant dense<0.000000e+00> : vector<8x32xf32>
    %68 = tpu.matmul %66, %67, %cst_36 {dimension_numbers = #tpu.dot_dimension_numbers<[1], [0], [0], [1], [0, 0, 1, 1], [], []>} : vector<8x32xbf16>, vector<32x32xbf16>, vector<8x32xf32> -> vector<8x32xf32>
    %c0_37 = arith.constant 0 : index
    %c0_38 = arith.constant 0 : index
    %69 = vector.load %arg12[%c0_37, %c0_38] : memref<1x32xf32, #tpu.memory_space<vmem>>, vector<1x32xf32>
    %70 = vector.broadcast %69 : vector<1x32xf32> to vector<8x32xf32>
    %71 = arith.addf %68, %70 : vector<8x32xf32>
    %72 = arith.addf %71, %65 : vector<8x32xf32>
    %cst_39 = arith.constant dense<0.000000e+00> : vector<8xf32>
    %73 = vector.multi_reduction <add>, %72, %cst_39 [1] : vector<8x32xf32> to vector<8xf32>
    %74 = vector.shape_cast %73 : vector<8xf32> to vector<8x1xf32>
    %cst_40 = arith.constant 3.200000e+01 : f32
    %75 = vector.broadcast %cst_40 : f32 to vector<8x1xf32>
    %76 = arith.divf %74, %75 : vector<8x1xf32>
    %77 = vector.broadcast %76 : vector<8x1xf32> to vector<8x32xf32>
    %78 = arith.subf %72, %77 : vector<8x32xf32>
    %79 = arith.mulf %78, %78 : vector<8x32xf32>
    %cst_41 = arith.constant dense<0.000000e+00> : vector<8xf32>
    %80 = vector.multi_reduction <add>, %79, %cst_41 [1] : vector<8x32xf32> to vector<8xf32>
    %81 = vector.shape_cast %80 : vector<8xf32> to vector<8x1xf32>
    %cst_42 = arith.constant 3.200000e+01 : f32
    %82 = vector.broadcast %cst_42 : f32 to vector<8x1xf32>
    %83 = arith.divf %81, %82 : vector<8x1xf32>
    %cst_43 = arith.constant 9.99999996E-13 : f32
    %84 = vector.broadcast %cst_43 : f32 to vector<8x1xf32>
    %85 = arith.addf %83, %84 : vector<8x1xf32>
    %86 = math.rsqrt %85 : vector<8x1xf32>
    %87 = vector.broadcast %86 : vector<8x1xf32> to vector<8x32xf32>
    %88 = arith.mulf %78, %87 : vector<8x32xf32>
    %c0_44 = arith.constant 0 : index
    %c0_45 = arith.constant 0 : index
    %89 = vector.load %arg13[%c0_44, %c0_45] : memref<1x32xf32, #tpu.memory_space<vmem>>, vector<1x32xf32>
    %90 = vector.broadcast %89 : vector<1x32xf32> to vector<8x32xf32>
    %91 = arith.mulf %88, %90 : vector<8x32xf32>
    %c0_46 = arith.constant 0 : index
    %c0_47 = arith.constant 0 : index
    %92 = vector.load %arg14[%c0_46, %c0_47] : memref<1x32xf32, #tpu.memory_space<vmem>>, vector<1x32xf32>
    %93 = vector.broadcast %92 : vector<1x32xf32> to vector<8x32xf32>
    %94 = arith.addf %91, %93 : vector<8x32xf32>
    %95 = vector.shape_cast %94 : vector<8x32xf32> to vector<1x8x32xf32>
    %c0_48 = arith.constant 0 : index
    %c0_49 = arith.constant 0 : index
    %c0_50 = arith.constant 0 : index
    %96 = vector.load %arg15[%c0_48, %c0_49, %c0_50] : memref<1x8x32xf32, #tpu.memory_space<vmem>>, vector<1x8x32xf32>
    tpu.vector_store %arg15[%c0_48, %c0_49, %c0_50], %95 {strides = array<i32>} : memref<1x8x32xf32, #tpu.memory_space<vmem>>, vector<1x8x32xf32>,
    return
  }
  func.func @transform_0(%arg0: i32) -> (i32, i32, i32) {
    %c0_i32 = arith.constant 0 : i32
    %c0_i32_0 = arith.constant 0 : i32
    %c0_i32_1 = arith.constant 0 : i32
    return %arg0, %c0_i32, %c0_i32_0 : i32, i32, i32
  }
  func.func @transform_1(%arg0: i32) -> (i32, i32, i32) {
    %c0_i32 = arith.constant 0 : i32
    %c0_i32_0 = arith.constant 0 : i32
    %c0_i32_1 = arith.constant 0 : i32
    return %arg0, %c0_i32, %c0_i32_0 : i32, i32, i32
  }
  func.func @transform_2(%arg0: i32) -> (i32, i32, i32) {
    %c0_i32 = arith.constant 0 : i32
    %c0_i32_0 = arith.constant 0 : i32
    %c0_i32_1 = arith.constant 0 : i32
    return %arg0, %c0_i32, %c0_i32_0 : i32, i32, i32
  }
  func.func @transform_3(%arg0: i32) -> (i32, i32, i32, i32) {
    %c0_i32 = arith.constant 0 : i32
    %c0_i32_0 = arith.constant 0 : i32
    %c0_i32_1 = arith.constant 0 : i32
    %c0_i32_2 = arith.constant 0 : i32
    return %arg0, %c0_i32, %c0_i32_0, %c0_i32_1 : i32, i32, i32, i32
  }
  func.func @transform_4(%arg0: i32) -> (i32, i32) {
    %c0_i32 = arith.constant 0 : i32
    %c0_i32_0 = arith.constant 0 : i32
    %c0_i32_1 = arith.constant 0 : i32
    return %c0_i32, %c0_i32_0 : i32, i32
  }
  func.func @transform_5(%arg0: i32) -> (i32, i32) {
    %c0_i32 = arith.constant 0 : i32
    %c0_i32_0 = arith.constant 0 : i32
    %c0_i32_1 = arith.constant 0 : i32
    return %c0_i32, %c0_i32_0 : i32, i32
  }
  func.func @transform_6(%arg0: i32) -> (i32, i32) {
    %c0_i32 = arith.constant 0 : i32
    %c0_i32_0 = arith.constant 0 : i32
    %c0_i32_1 = arith.constant 0 : i32
    return %c0_i32, %c0_i32_0 : i32, i32
  }
  func.func @transform_7(%arg0: i32) -> (i32, i32) {
    %c0_i32 = arith.constant 0 : i32
    %c0_i32_0 = arith.constant 0 : i32
    %c0_i32_1 = arith.constant 0 : i32
    return %c0_i32, %c0_i32_0 : i32, i32
  }
  func.func @transform_8(%arg0: i32) -> (i32, i32) {
    %c0_i32 = arith.constant 0 : i32
    %c0_i32_0 = arith.constant 0 : i32
    %c0_i32_1 = arith.constant 0 : i32
    return %c0_i32, %c0_i32_0 : i32, i32
  }
  func.func @transform_9(%arg0: i32) -> (i32, i32) {
    %c0_i32 = arith.constant 0 : i32
    %c0_i32_0 = arith.constant 0 : i32
    %c0_i32_1 = arith.constant 0 : i32
    return %c0_i32, %c0_i32_0 : i32, i32
  }
  func.func @transform_10(%arg0: i32) -> (i32, i32) {
    %c0_i32 = arith.constant 0 : i32
    %c0_i32_0 = arith.constant 0 : i32
    %c0_i32_1 = arith.constant 0 : i32
    return %c0_i32, %c0_i32_0 : i32, i32
  }
  func.func @transform_11(%arg0: i32) -> (i32, i32) {
    %c0_i32 = arith.constant 0 : i32
    %c0_i32_0 = arith.constant 0 : i32
    %c0_i32_1 = arith.constant 0 : i32
    return %c0_i32, %c0_i32_0 : i32, i32
  }
  func.func @transform_12(%arg0: i32) -> (i32, i32) {
    %c0_i32 = arith.constant 0 : i32
    %c0_i32_0 = arith.constant 0 : i32
    %c0_i32_1 = arith.constant 0 : i32
    return %c0_i32, %c0_i32_0 : i32, i32
  }
  func.func @transform_13(%arg0: i32) -> (i32, i32) {
    %c0_i32 = arith.constant 0 : i32
    %c0_i32_0 = arith.constant 0 : i32
    %c0_i32_1 = arith.constant 0 : i32
    return %c0_i32, %c0_i32_0 : i32, i32
  }
  func.func @transform_14(%arg0: i32) -> (i32, i32, i32) {
    %c0_i32 = arith.constant 0 : i32
    %c0_i32_0 = arith.constant 0 : i32
    %c0_i32_1 = arith.constant 0 : i32
    return %arg0, %c0_i32, %c0_i32_0 : i32, i32, i32
  }
}

</mosaic_0001>

<bundles_post_ra>
// kernel: tpu_custom_call.1
= control target key start
LH: loop header
LB: loop body
LE: loop exit
PB: predicated region body
PF: predicated region fallthrough
CT: control target
= control target key end

     0   :  { %s2480_s0 = inlined_call_operand.hbm [shape: bf16[2,8,32], index: 0, kind: input, shape index: {}]   ;;  %s2481_s1 = inlined_call_operand.hbm [shape: bf16[2,8,32], index: 1, kind: input, shape index: {}]   ;;  %s2482_s2 = inlined_call_operand.hbm [shape: bf16[2,8,32], index: 2, kind: input, shape index: {}]   ;;  %s2483_s3 = inlined_call_operand.vmem [shape: f32[2,1,1,8], index: 3, kind: input, shape index: {}]   ;;  %s2484_s4 = inlined_call_operand.hbm [shape: bf16[32,32], index: 4, kind: input, shape index: {}]   ;;  %s2485_s5 = inlined_call_operand.hbm [shape: f32[1,32], index: 5, kind: input, shape index: {}]   ;;  %s2486_s6 = inlined_call_operand.vmem [shape: bf16[32,32], index: 6, kind: input, shape index: {}]   ;;  %s2487_s7 = inlined_call_operand.hbm [shape: f32[1,32], index: 7, kind: input, shape index: {}]   ;;  %s2488_s8 = inlined_call_operand.hbm [shape: bf16[32,32], index: 8, kind: input, shape index: {}]   ;;  %s2489_s9 = inlined_call_operand.hbm [shape: f32[1,32], index: 9, kind: input, shape index: {}]   ;;  %s2490_s10 = inlined_call_operand.vmem [shape: bf16[32,32], index: 10, kind: input, shape index: {}]   ;;  %s2491_s11 = inlined_call_operand.vmem [shape: f32[1,32], index: 11, kind: input, shape index: {}]   ;;  %s2492_s12 = inlined_call_operand.vmem [shape: f32[1,32], index: 12, kind: input, shape index: {}]   ;;  %s2493_s13 = inlined_call_operand.vmem [shape: f32[1,32], index: 13, kind: input, shape index: {}]   ;;  %s2494_s14 = inlined_call_operand.hbm [shape: f32[2,8,32], index: 14, kind: output, shape index: {}]  }
   0x1   :  { %2519 = sst [smem:[#allocation29_spill]] %s2481_s1 }
   0x2   :  { %2520 = sst [smem:[#allocation30_spill]] %s2483_s3 }
   0x3   :  { %2521 = sst [smem:[#allocation31_spill]] %s2484_s4 }
   0x4   :  { %2522 = sst [smem:[#allocation32_spill]] %s2487_s7 }
   0x5   :  { %2523 = sst [smem:[#allocation33_spill]] %s2490_s10 }
   0x6   :  { %2524 = sst [smem:[#allocation34_spill]] %s2491_s11 }
   0x7   :  { %2525 = sst [smem:[#allocation35_spill]] %s2492_s12 }
   0x8   :  { %2526 = sst [smem:[#allocation36_spill]] %s2493_s13 }
   0x9   :  { %2527 = sst [smem:[#allocation37_spill]] %s2494_s14 }
   0xa   :  { %19 = vsyncpa [#allocation3], 0 }
   0xb   :  { %21 = vsyncpa [#allocation3 + $0x1], 0 }
   0xc   :  { %22 = vsyncpa [#allocation6], 0 }
   0xd   :  { %24 = vsyncpa [#allocation6 + $0x1], 0 }
   0xe   :  { %25 = vsyncpa [#allocation9], 0 }
   0xf   :  { %26 = vsyncpa [#allocation12], 0 }
  0x10   :  { %27 = vsyncpa [#allocation15], 0 }
  0x11   :  { %28 = vsyncpa [#allocation4], 0 }
  0x12   :  { %30 = vsyncpa [#allocation4 + $0x1], 0  ;;  %s2018_s29 = smov 0   ;;  %s2020_s30 = smov 0  }
  0x13   :  { %s2022_s15 = smov 0   ;;  %s2024_s16 = smov 0  }
  0x14 LB: > { %2528 = sst [smem:[#allocation23_spill]] %s1914_s29  ;;  %s1928_s17 = smov [#allocation8]   ;;  %s1926_s16 = sphi %s2024_s16, %s2574_s16   ;;  %s1922_s15 = sphi %s2022_s15, %s2578_s15   ;;  %s1918_s30 = sphi %s2020_s30, %s2577_s30   ;;  %s1914_s29 = sphi %s2018_s29, %s2576_s29  }
  0x15   : > { %2529 = sst [smem:[#allocation24_spill]] %s1926_s16  ;;  %s393_s18 = sshll.u32 %s1928_s17, 4  ;;  %s2044_s18 = int_to_ptr.vmem [resolvable:$true] %s393_s18 }
  0x16   : > { %s2039_s19 = sadd.s32 4294967295, %s1926_s16   ;;  %p1357_p0 = scmp.ge.s32.totalorder %s1926_s16, 1 }
  0x17   : > { %p2506_p1 = scmp.eq.s32.totalorder %s2039_s19, 0  ;;  %p381_p2 = scmp.lt.s32.totalorder %s1926_s16, 3 }
  0x18   : > { %s1929_s21 = smov [#allocation11]   ;;  %s2532_s4 = sld [smem:[#allocation31_spill]] }
  0x19   : > { %p2046_p3 = pnand %p1357_p0, %p381_p2  ;;  %s421_s22 = sshll.u32 %s1929_s21, 4  ;;  %s2059_s22 = int_to_ptr.vmem [resolvable:$true] %s421_s22 }
  0x1b   : > { %s2530_s20 = scalar_select %p2046_p3, 1, 0 }
  0x1c   : > { %p1511_p5 = pneg %p2046_p3 }
  0x1e   : > { %p2055_p6 = pnand %p1511_p5, %p2506_p1  ;;  %s1614_s26 = scalar_lea.hbm %s2532_s4, 256 }
  0x1f   : > { %p1615_p7 = scmp.ne.s32.totalorder %s2532_s4, %s1614_s26  ;;  %p1621_p11 = scmp.lt.u32.totalorder %s1614_s26, %s2532_s4 }
  0x20   : > { %s2531_s23 = scalar_select %p2055_p6, 1, 0 }
  0x21   : > { %p2069_p8 = pneg %p2055_p6 }
  0x23   : > { %s2533_s17 = scalar_select %p2069_p8, 1, 0 }
  0x24   : > { %p1617_p9 = pnand %p2069_p8, %p1615_p7 }
  0x26   : > { %p1618_p10 = pneg %p1617_p9 }
  0x28   : > { %p1623_p12 = pnand %p1621_p11, %p1618_p10 }
  0x2a   : > { %1626 = shalt.err (!%p1623_p12)
}
  0x2b   : > { %s1627_s24 = scalar_lea.vmem %s2044_s18, 256  ;;  %p1635_p5 = scmp.lt.s32.totalorder %s2044_s18, %s2044_s18 }
  0x2c   : > { %p1628_p13 = scmp.ne.s32.totalorder %s2044_s18, %s1627_s24  ;;  %p1636_p4 = scmp.lt.s32.totalorder %s1627_s24, %s1627_s24 }
  0x2e   : > { %p1630_p0 = pnand %p1628_p13, %p2069_p8  ;;  %p1637_p7 = por %p1636_p4, %p1635_p5 }
  0x30   : > { %p1631_p2 = pneg %p1630_p0 }
  0x32   : > { %p1638_p9 = pnand %p1637_p7, %p1631_p2 }
  0x34   : > { %1641 = shalt.err (!%p1638_p9)
}
  0x35   : > { %s2498_s25 = smov 64   ;;  %s2499_s14 = smov 4  }
  0x36   : > { %1514 = dma.hbm_to_vmem [thread:$0]  (!%p2055_p6), %s2532_s4, 256, %s2044_s18, [#allocation9], %s2498_s25, %s2498_s25, %s2499_s14  }
  0x37   : > { %s2534_s7 = sld [smem:[#allocation32_spill]] }
  0x3d   : > { %s1642_s24 = scalar_lea.hbm %s2534_s7, 16 }
  0x3e   : > { %p1643_p4 = scmp.ne.s32.totalorder %s2534_s7, %s1642_s24  ;;  %p1649_p12 = scmp.lt.u32.totalorder %s1642_s24, %s2534_s7 }
  0x40   : > { %p1645_p10 = pnand %p1643_p4, %p2069_p8 }
  0x42   : > { %p1646_p11 = pneg %p1645_p10 }
  0x44   : > { %p1651_p13 = pnand %p1649_p12, %p1646_p11 }
  0x46   : > { %1654 = shalt.err (!%p1651_p13)
}
  0x47   : > { %s1655_s18 = scalar_lea.vmem %s2059_s22, 16  ;;  %s1662_s12 = scalar_lea.vmem %s2059_s22, 32 }
  0x48   : > { %p1656_p0 = scmp.ne.s32.totalorder %s2059_s22, %s1655_s18  ;;  %p1663_p7 = scmp.lt.s32.totalorder %s2059_s22, %s2059_s22 }
  0x49   : > { %p1664_p9 = scmp.lt.s32.totalorder %s1662_s12, %s1655_s18 }
  0x4a   : > { %p1658_p2 = pnand %p1656_p0, %p2069_p8 }
  0x4b   : > { %p1665_p4 = por %p1664_p9, %p1663_p7 }
  0x4c   : > { %p1659_p5 = pneg %p1658_p2 }
  0x4e   : > { %p1666_p10 = pnand %p1665_p4, %p1659_p5 }
  0x50   : > { %1669 = shalt.err (!%p1666_p10)
}
  0x51   : > { %1520 = dma.hbm_to_vmem [thread:$0]  (!%p2055_p6), %s2534_s7, 16, %s2059_s22, [#allocation12]  }
  0x52   : > { %s1356_s13 = sadd.s32 4294967294, %s1926_s16   ;;  %s2119_s26 = sadd.s32 1, %s1926_s16  }
  0x53   : > { %2535 = sst [smem:[#allocation25_spill]] %s2119_s26  ;;  %s40_s27 = ssub.s32 %s1926_s16, %s2119_s26 }
  0x54   : > { %s43_s28 = sadd.s32 1, %s1922_s15  ;;  %p41_p11 = scmp.eq.s32.totalorder %s40_s27, 0 }
  0x55   : > { %p50_p12 = scmp.ne.s32.totalorder %s1922_s15, %s1918_s30  ;;  %p51_p13 = scmp.eq.s32.totalorder %s1926_s16, 0 }
  0x56   : > { %p56_p0 = scmp.ne.s32.totalorder %s1918_s30, %s1914_s29  ;;  %p368_p7 = scmp.eq.s32.totalorder %s2039_s19, 1 }
  0x57   : > { %s2130_s21 = scalar_select %p41_p11, %s1922_s15, %s43_s28  }
  0x58   : > { %p52_p2 = por %p51_p13, %p50_p12  ;;  %p2134_p5 = por %p2506_p1, %p56_p0 }
  0x59   : > { %2536 = sst [smem:[#allocation26_spill]] %s2130_s21  ;;  %p374_p9 = scmp.eq.s32.totalorder %s1356_s13, 1 }
  0x5a   : > { %s2537_s24 = scalar_select %p2134_p5, 1, 0 }
  0x5b   : > { %p1546_p4 = scmp.lt.s32.totalorder %s1926_s16, 2  ;;  %s2500_s22 = sand.u32 1, %s1922_s15  }
  0x5c   : > { %p2141_p10 = por %p368_p7, %p50_p12  ;;  %p2145_p3 = por %p374_p9, %p56_p0 }
  0x5d   : > { %s2151_s10 = sshll.u32 %s2500_s22, 2  ;;  %s2154_s11 = sshll.u32 %s1926_s16, 6 }
  0x5e   : > { %s2538_s18 = scalar_select %p2141_p10, 1, 0 }
  0x5f   : > { %s2540_s12 = scalar_select %p2145_p3, 1, 0 }
  0x60   : > { %2539 = sst [smem:[#allocation27_spill]] %s2538_s18  ;;  %p2156_p11 = pnand %p1546_p4, %p52_p2 }
  0x61   : > { %2541 = sst [smem:[#allocation28_spill]] %s2540_s12  ;;  %s486_s13 = sand.u32 1, %s1926_s16  }
  0x62   : > { %s2542_s27 = scalar_select %p2156_p11, 1, 0 }
  0x63   : > { %s2543_s1 = sld [smem:[#allocation29_spill]]  ;;  %s490_s22 = scalar_lea.vmem [#allocation5], %s2151_s10 }
  0x64   : > { %s497_s4 = sshll.u32 %s490_s22, 4  ;;  %s1932_s7 = smov [#allocation10]   ;;  %s2168_s4 = int_to_ptr.vmem [resolvable:$true] %s497_s4 }
  0x65   : > { %s2170_s21 = sshll.u32 %s1932_s7, 4  ;;  %s2172_s26 = scalar_lea.sflag [#allocation6], %s486_s13  ;;  %s408_s21 = int_to_ptr.vmem [resolvable:$true] %s2170_s21 }
  0x66   : > { %p2178_p13 = pneg %p2156_p11 }
  0x68   : > { %s2544_s25 = scalar_select %p2178_p13, 1, 0 }
  0x69   : > { %s2165_s14 = scalar_lea.hbm %s2543_s1, %s2154_s11  ;;  %s1675_s16 = scalar_lea.hbm %s2543_s1, 128 }
  0x6a   : > { %s1670_s12 = scalar_lea.hbm %s2165_s14, 64  ;;  %p1676_p7 = scmp.lt.u32.totalorder %s2165_s14, %s2543_s1 }
  0x6b   : > { %p1671_p12 = scmp.ne.s32.totalorder %s2165_s14, %s1670_s12  ;;  %p1677_p9 = scmp.lt.u32.totalorder %s1675_s16, %s1670_s12 }
  0x6c   : > { %p1679_p1 = scmp.lt.u32.totalorder %s1670_s12, %s2165_s14 }
  0x6d   : > { %p1673_p0 = pnand %p2178_p13, %p1671_p12  ;;  %p1678_p4 = por %p1677_p9, %p1676_p7 }
  0x6f   : > { %p1674_p2 = pneg %p1673_p0  ;;  %p1680_p3 = por %p1679_p1, %p1678_p4 }
  0x71   : > { %p1681_p10 = pnand %p1680_p3, %p1674_p2 }
  0x73   : > { %1684 = shalt.err (!%p1681_p10)
}
  0x74   : > { %s1685_s13 = scalar_lea.vmem %s2168_s4, 64  ;;  %s1933_s28 = smov [#allocation5]  }
  0x75   : > { %p1686_p12 = scmp.ne.s32.totalorder %s2168_s4, %s1685_s13  ;;  %s1690_s22 = sshll.u32 %s1933_s28, 4  ;;  %s1691_s22 = int_to_ptr.vmem [resolvable:$false] %s1690_s22 }
  0x76   : > { %s1692_s29 = scalar_lea.vmem %s1691_s22, 128  ;;  %p1693_p6 = scmp.lt.s32.totalorder %s2168_s4, %s1691_s22 }
  0x77   : > { %p1688_p0 = pnand %p1686_p12, %p2178_p13  ;;  %p1694_p8 = scmp.lt.s32.totalorder %s1692_s29, %s1685_s13 }
  0x79   : > { %p1689_p5 = pneg %p1688_p0  ;;  %p1695_p7 = por %p1694_p8, %p1693_p6 }
  0x7b   : > { %p1696_p9 = pnand %p1695_p7, %p1689_p5 }
  0x7d   : > { %1699 = shalt.err (!%p1696_p9)
}
  0x7e   : > { %1533 = dma.hbm_to_vmem [thread:$0]  (!%p2156_p11), %s2165_s14, 64, %s2168_s4, %s2172_s26  }
  0x7f   : > { %s1700_s7 = scalar_lea.hbm %s2485_s5, 16  ;;  %p2545_p3 = scmp.ne.s32.totalorder %s2533_s17, 0 }
  0x80   : > { %p1701_p1 = scmp.ne.s32.totalorder %s2485_s5, %s1700_s7  ;;  %p1707_p5 = scmp.lt.u32.totalorder %s1700_s7, %s2485_s5 }
  0x82   : > { %p1703_p6 = pnand %p1701_p1, %p2545_p3 }
  0x84   : > { %p1704_p8 = pneg %p1703_p6 }
  0x86   : > { %p1709_p10 = pnand %p1707_p5, %p1704_p8 }
  0x88   : > { %1712 = shalt.err (!%p1709_p10)
}
  0x89   : > { %s1713_s29 = scalar_lea.vmem %s408_s21, 16  ;;  %s1720_s4 = scalar_lea.vmem %s408_s21, 32 }
  0x8a   : > { %p1714_p2 = scmp.ne.s32.totalorder %s408_s21, %s1713_s29  ;;  %p1721_p0 = scmp.lt.s32.totalorder %s408_s21, %s408_s21 }
  0x8b   : > { %p1722_p7 = scmp.lt.s32.totalorder %s1720_s4, %s1713_s29 }
  0x8c   : > { %p1716_p4 = pnand %p1714_p2, %p2545_p3 }
  0x8d   : > { %p1723_p9 = por %p1722_p7, %p1721_p0 }
  0x8e   : > { %p1717_p12 = pneg %p1716_p4 }
  0x90   : > { %p1724_p11 = pnand %p1723_p9, %p1717_p12 }
  0x92   : > { %1727 = shalt.err (!%p1724_p11)
}
  0x93   : > { %p2546_p1 = scmp.ne.s32.totalorder %s2531_s23, 0  ;;  %s1934_s16 = smov [#allocation13]  }
  0x94   : > { %s431_s12 = sshll.u32 %s1934_s16, 4  ;;  %s1935_s7 = smov [#allocation14]   ;;  %s432_s12 = int_to_ptr.vmem [resolvable:$true] %s431_s12 }
  0x95   : > { %1517 = dma.hbm_to_vmem [thread:$0]  (!%p2546_p1), %s2485_s5, 16, %s408_s21, [#allocation9]  }
  0x96   : > { %s445_s28 = sshll.u32 %s1935_s7, 4  ;;  %s1728_s18 = scalar_lea.hbm %s2488_s8, 256  ;;  %s446_s28 = int_to_ptr.vmem [resolvable:$true] %s445_s28 }
  0x97   : > { %p1729_p11 = scmp.ne.s32.totalorder %s2488_s8, %s1728_s18  ;;  %p1735_p5 = scmp.lt.u32.totalorder %s1728_s18, %s2488_s8 }
  0x99   : > { %p1731_p6 = pnand %p1729_p11, %p2545_p3 }
  0x9b   : > { %p1732_p8 = pneg %p1731_p6 }
  0x9d   : > { %p1737_p10 = pnand %p1735_p5, %p1732_p8 }
  0x9f   : > { %1740 = shalt.err (!%p1737_p10)
}
  0xa0   : > { %s1741_s21 = scalar_lea.vmem %s432_s12, 256  ;;  %p1749_p0 = scmp.lt.s32.totalorder %s432_s12, %s432_s12 }
  0xa1   : > { %p1742_p2 = scmp.ne.s32.totalorder %s432_s12, %s1741_s21  ;;  %p1750_p7 = scmp.lt.s32.totalorder %s1741_s21, %s1741_s21 }
  0xa3   : > { %p1744_p4 = pnand %p1742_p2, %p2545_p3  ;;  %p1751_p9 = por %p1750_p7, %p1749_p0 }
  0xa5   : > { %p1745_p12 = pneg %p1744_p4 }
  0xa7   : > { %p1752_p13 = pnand %p1751_p9, %p1745_p12 }
  0xa9   : > { %1755 = shalt.err (!%p1752_p13)
}
  0xaa   : > { %s2547_s14 = smov 4   ;;  %s2548_s16 = smov 64  }
  0xab   : > { %1523 = dma.hbm_to_vmem [thread:$0]  (!%p2546_p1), %s2488_s8, 256, %s432_s12, [#allocation12], %s2548_s16, %s2548_s16, %s2547_s14  }
  0xac   : > { %s1756_s22 = scalar_lea.hbm %s2489_s9, 16 }
  0xad   : > { %p1757_p11 = scmp.ne.s32.totalorder %s2489_s9, %s1756_s22  ;;  %p1763_p8 = scmp.lt.u32.totalorder %s1756_s22, %s2489_s9 }
  0xaf   : > { %p1759_p13 = pnand %p1757_p11, %p2545_p3 }
  0xb1   : > { %p1760_p6 = pneg %p1759_p13 }
  0xb3   : > { %p1765_p5 = pnand %p1763_p8, %p1760_p6 }
  0xb5   : > { %1768 = shalt.err (!%p1765_p5)
}
  0xb6   : > { %s1769_s3 = scalar_lea.vmem %s446_s28, 16  ;;  %s1776_s12 = scalar_lea.vmem %s446_s28, 32 }
  0xb7   : > { %p1770_p10 = scmp.ne.s32.totalorder %s446_s28, %s1769_s3  ;;  %p1777_p12 = scmp.lt.s32.totalorder %s446_s28, %s446_s28 }
  0xb8   : > { %p1778_p0 = scmp.lt.s32.totalorder %s1776_s12, %s1769_s3 }
  0xb9   : > { %p1772_p2 = pnand %p1770_p10, %p2545_p3 }
  0xba   : > { %p1779_p7 = por %p1778_p0, %p1777_p12 }
  0xbb   : > { %p1773_p4 = pneg %p1772_p2 }
  0xbd   : > { %p1780_p9 = pnand %p1779_p7, %p1773_p4 }
  0xbf   : > { %1783 = shalt.err (!%p1780_p9)
}
  0xc0   : > { %1526 = dma.hbm_to_vmem [thread:$0]  (!%p2546_p1), %s2489_s9, 16, %s446_s28, [#allocation15]  }
  0xc1   : > { %s2264_s7 = scalar_lea.hbm %s2480_s0, %s2154_s11  ;;  %s472_s13 = scalar_lea.vmem [#allocation2], %s2151_s10 }
  0xc2   : > { %s479_s23 = sshll.u32 %s472_s13, 4  ;;  %s2273_s4 = scalar_lea.hbm %s2482_s2, %s2154_s11  ;;  %s2267_s23 = int_to_ptr.vmem [resolvable:$true] %s479_s23 }
  0xc3   : > { %s2549_s1 = sand.u32 1, %s1922_s15   ;;  %s1784_s21 = scalar_lea.hbm %s2264_s7, 64 }
  0xc4   : > { %s469_s28 = scalar_lea.sflag [#allocation3], %s2549_s1  ;;  %p1785_p3 = scmp.ne.s32.totalorder %s2264_s7, %s1784_s21 }
  0xc5   : > { %p2550_p1 = scmp.ne.s32.totalorder %s2544_s25, 0  ;;  %s1789_s14 = scalar_lea.hbm %s2480_s0, 128 }
  0xc6   : > { %p1790_p6 = scmp.lt.u32.totalorder %s2264_s7, %s2480_s0  ;;  %p1791_p8 = scmp.lt.u32.totalorder %s1789_s14, %s1784_s21 }
  0xc7   : > { %p1787_p11 = pnand %p1785_p3, %p2550_p1  ;;  %p1793_p10 = scmp.lt.u32.totalorder %s1784_s21, %s2264_s7 }
  0xc8   : > { %p1792_p5 = por %p1791_p8, %p1790_p6 }
  0xc9   : > { %p1788_p13 = pneg %p1787_p11 }
  0xca   : > { %p1794_p2 = por %p1793_p10, %p1792_p5 }
  0xcc   : > { %p1795_p4 = pnand %p1794_p2, %p1788_p13 }
  0xce   : > { %1798 = shalt.err (!%p1795_p4)
}
  0xcf   : > { %s1799_s11 = scalar_lea.vmem %s2267_s23, 64  ;;  %s1936_s18 = smov [#allocation2]  }
  0xd0   : > { %p1800_p12 = scmp.ne.s32.totalorder %s2267_s23, %s1799_s11  ;;  %s1804_s13 = sshll.u32 %s1936_s18, 4  ;;  %s1805_s13 = int_to_ptr.vmem [resolvable:$false] %s1804_s13 }
  0xd1   : > { %s1806_s22 = scalar_lea.vmem %s1805_s13, 128  ;;  %p1807_p9 = scmp.lt.s32.totalorder %s2267_s23, %s1805_s13 }
  0xd2   : > { %p1802_p0 = pnand %p1800_p12, %p2550_p1  ;;  %p1808_p3 = scmp.lt.s32.totalorder %s1806_s22, %s1799_s11 }
  0xd4   : > { %p1803_p7 = pneg %p1802_p0  ;;  %p1809_p11 = por %p1808_p3, %p1807_p9 }
  0xd6   : > { %p1810_p6 = pnand %p1809_p11, %p1803_p7 }
  0xd8   : > { %1813 = shalt.err (!%p1810_p6)
}
  0xd9   : > { %p2551_p13 = scmp.ne.s32.totalorder %s2542_s27, 0  ;;  %s508_s29 = scalar_lea.vmem [#allocation7], %s2151_s10 }
  0xda   : > { %s515_s1 = sshll.u32 %s508_s29, 4  ;;  %s1814_s21 = scalar_lea.hbm %s2273_s4, 64  ;;  %s516_s1 = int_to_ptr.vmem [resolvable:$true] %s515_s1 }
  0xdb   : > { %1530 = dma.hbm_to_vmem [thread:$0]  (!%p2551_p13), %s2264_s7, 64, %s2267_s23, %s469_s28  }
  0xdc   : > { %p1815_p8 = scmp.ne.s32.totalorder %s2273_s4, %s1814_s21  ;;  %s1819_s14 = scalar_lea.hbm %s2482_s2, 128 }
  0xdd   : > { %p1820_p2 = scmp.lt.u32.totalorder %s2273_s4, %s2482_s2  ;;  %p1821_p4 = scmp.lt.u32.totalorder %s1819_s14, %s1814_s21 }
  0xde   : > { %p1817_p5 = pnand %p1815_p8, %p2550_p1  ;;  %p1823_p0 = scmp.lt.u32.totalorder %s1814_s21, %s2273_s4 }
  0xdf   : > { %p1822_p12 = por %p1821_p4, %p1820_p2 }
  0xe0   : > { %p1818_p10 = pneg %p1817_p5 }
  0xe1   : > { %p1824_p7 = por %p1823_p0, %p1822_p12 }
  0xe3   : > { %p1825_p9 = pnand %p1824_p7, %p1818_p10 }
  0xe5   : > { %1828 = shalt.err (!%p1825_p9)
}
  0xe6   : > { %s1829_s10 = scalar_lea.vmem %s516_s1, 64  ;;  %s1937_s7 = smov [#allocation7]  }
  0xe7   : > { %p1830_p3 = scmp.ne.s32.totalorder %s516_s1, %s1829_s10  ;;  %s1834_s23 = sshll.u32 %s1937_s7, 4  ;;  %s1835_s23 = int_to_ptr.vmem [resolvable:$false] %s1834_s23 }
  0xe8   : > { %s1836_s28 = scalar_lea.vmem %s1835_s23, 128  ;;  %p1837_p8 = scmp.lt.s32.totalorder %s516_s1, %s1835_s23 }
  0xe9   : > { %p1832_p11 = pnand %p1830_p3, %p2550_p1  ;;  %p1838_p5 = scmp.lt.s32.totalorder %s1836_s28, %s1829_s10 }
  0xeb   : > { %p1833_p6 = pneg %p1832_p11  ;;  %p1839_p13 = por %p1838_p5, %p1837_p8 }
  0xed   : > { %p1840_p2 = pnand %p1839_p13, %p1833_p6 }
  0xef   : > { %1843 = shalt.err (!%p1840_p2)
}
  0xf0   : > { %p2552_p4 = scmp.ne.s32.totalorder %s2542_s27, 0  ;;  %p2553_p10 = scmp.ne.s32.totalorder %s2530_s20, 0 }
  0xf1   : > { %s2320_s25 = sand.u32 (!%p2553_p10), 1, %s1918_s30   ;;  %p2554_p1 = scmp.ne.s32.totalorder (!%p2553_p10), %s2537_s24, 0 }
  0xf2   : > { %1536 = dma.hbm_to_vmem [thread:$0]  (!%p2552_p4), %s2273_s4, 64, %s516_s1, %s2172_s26  }
  0xf3   : > { %530 = sbr.rel (%p2553_p10) target bundleno = 2016 (0x7e0), region = 76  ;;  %s2323_s11 = sshll.u32 (!%p2553_p10), %s2320_s25, 2 }
  0xf4   : > { %s533_s18 = scalar_lea.sflag (!%p2553_p10), [#allocation3], %s2320_s25  ;;  %s536_s13 = scalar_lea.vmem (!%p2553_p10), [#allocation2], %s2323_s11 }
  0xfa   : > { %1889 = dma.done.wait (%p2554_p1), %s533_s18, 64  }
  0xfb   : > { %1891 = vsyncadd (%p2554_p1), %s533_s18, 4294967232  ;;  %s541_s20 = sand.u32 1, %s2039_s19   ;;  %s545_s27 = scalar_lea.vmem [#allocation5], %s2323_s11 }
  0xfc   : > { %s542_s26 = scalar_lea.sflag [#allocation6], %s541_s20 }
  0xfd   : > { %1893 = dma.done.wait (%p2554_p1), %s542_s26, 128  }
  0xfe   : > { %1895 = vsyncadd (%p2554_p1), %s542_s26, 4294967168  ;;  %s554_s4 = scalar_lea.vmem [#allocation7], %s2323_s11  ;;  %p2555_p13 = scmp.eq.s32.totalorder %s2039_s19, 0 }
 0x100   : > { %1897 = dma.done.wait (%p2555_p13), [#allocation9], 272   ;;  %p2556_p12 = pmov %p2555_p13 }
 0x102   : > { %1899 = vsyncadd (%p2556_p12), [#allocation9], 4294967024  ;;  %p2557_p0 = pmov %p2556_p12 }
 0x104   : > { %1901 = dma.done.wait (%p2557_p0), [#allocation12], 272   ;;  %p2558_p7 = pmov %p2557_p0 }
 0x105   : > { %p2559_p9 = pmov %p2557_p0 }
 0x106   : > { %1903 = vsyncadd (%p2558_p7), [#allocation12], 4294967024 }
 0x107   : > { %1905 = dma.done.wait (%p2559_p9), [#allocation15], 16   ;;  %p2560_p3 = pmov %p2557_p0 }
 0x108   : > { %v1938_v0 = vmov 0.0   ;;  %vm1939_vm0 = vmmov 0   ;;  %v1596_v1 = vld [vmem:[%s2486_s6] sm:$0xff]   ;;  %v1597_v2 = vld [vmem:[%s2486_s6 + $0x8] sm:$0xff]   ;;  %v1598_v3 = vld [vmem:[#allocation8] sm:$0xff]   ;;  %vm662_vm1 = vcmask 261120  }
 0x109   : > { %1907 = vsyncadd (%p2560_p3), [#allocation15], 4294967280  ;;  %1435 = vmatprep.subr.bf16.mxu1 %v1938_v0  ;;  %1427 = vmatprep.subr.bf16.mxu0 %v1938_v0  ;;  %v637_v4 = vld [vmem:[%s545_s27] sm:$0xf]  ;;  %v1599_v5 = vld [vmem:[#allocation8 + $0x8] sm:$0xff]   ;;  %vm848_vm2 = vcmask 130048  }
 0x10a   : > { %1439 = vmatprep.mubr.msk.bf16.mxu1 %vm1939_vm0, %v1938_v0  ;;  %1431 = vmatprep.mubr.msk.bf16.mxu0 %vm1939_vm0, %v1938_v0  ;;  %v636_v6 = vld [vmem:[%s536_s13] sm:$0xf]  ;;  %v1384_v7 = vld [vmem:[#allocation11] ss:$0 sm:$0xff]  ;;  %v1380_v9 = vld [vmem:[#allocation10] ss:$0 sm:$0xff] }
 0x10b   : > { %1436 = vmatpush3.bf16.msra.mxu1 %v1596_v1  ;;  %1428 = vmatpush3.bf16.msra.mxu0 %v1598_v3  ;;  %s1940_s21 = smov 112   ;;  %v1600_v22 = vld [vmem:[#allocation13] sm:$0xff]   ;;  %v1601_v23 = vld [vmem:[#allocation13 + $0x8] sm:$0xff]   ;;  %p632_p11 = scmp.lt.s32.totalorder %s2039_s19, 1  ;;  %vm895_vm3 = vcmask 64512   ;;  %vm911_vm4 = vcmask 1043456  }
 0x10c   : > { %1437 = vmatprep.subr.bf16.mxu1 %v1938_v0  ;;  %1429 = vmatprep.subr.bf16.mxu0 %v1938_v0  ;;  %v638_v24 = vld [vmem:[%s554_s4] sm:$0xf]  ;;  %s2561_s16 = sld [smem:[#allocation30_spill]]  ;;  %v1388_v49 = vld [vmem:[#allocation14] ss:$0 sm:$0xff]  ;;  %s2562_s23 = sld [smem:[#allocation33_spill]] }
 0x10d   : > { %s633_s3 = scalar_select %p632_p11, %s2039_s19, 1 }
 0x10e   : > { %s1941_s18 = smov 16   ;;  %s2563_s26 = sld [smem:[#allocation34_spill]] }
 0x10f   : > { %1438 = vmatpush3.bf16.msra.mxu1 %v1597_v2  ;;  %1430 = vmatpush3.bf16.msra.mxu0 %v1599_v5  ;;  %s1379_s27 = sshll.u32 %s2320_s25, 3  ;;  %s2564_s4 = sld [smem:[#allocation27_spill]] }
 0x110   : > { %1451 = vmatprep.subr.bf16.mxu1 %v1938_v0  ;;  %1443 = vmatprep.subr.bf16.mxu0 %v1938_v0  ;;  %s2565_s29 = sld [smem:[#allocation35_spill]]  ;;  %s1404_s12 = sshll.u32 %s2039_s19, 7 }
 0x111   : > { %s631_s14 = scalar_lea.vmem [#allocation16], %s1379_s27  ;;  %s2567_s7 = sld [smem:[#allocation37_spill]] }
 0x112   : > { %1440 = vmatmul.mubr.msk.bf16.vlgmr.msra.gmra.mrb[0].mxu1 %vm662_vm1, %v637_v4  ;;  %1432 = vmatmul.mubr.msk.bf16.vlgmr.msra.gmra.mrb[0].mxu0 %vm662_vm1, %v636_v6  ;;  %s634_s17 = scalar_lea.vmem %s2561_s16, %s633_s3  ;;  %v1602_v6 = vld [vmem:[%s2562_s23] sm:$0xff]   ;;  %s2566_s3 = sld [smem:[#allocation36_spill]] }
 0x113   : > { %1453 = vmatprep.mubr.msk.bf16.mxu1 %vm1939_vm0, %v1938_v0  ;;  %1447 = vmatprep.mubr.msk.bf16.mxu0 %vm1939_vm0, %v1938_v0  ;;  %v1392_v28 = vld [vmem:[%s634_s17] ss:$0 sm:$0xff]  ;;  %s1186_s16 = sshll.u32 %s631_s14, 4  ;;  %s1173_s11 = scalar_lea.sflag [#allocation4], %s2320_s25  ;;  %s2437_s16 = int_to_ptr.vmem [resolvable:$true] %s1186_s16 }
 0x114   : > { %1444 = vmatpush3.bf16.msra.mxu0 %v1600_v22  ;;  %s1942_s19 = smov [#allocation16]  }
 0x115   : > { %1445 = vmatprep.subr.bf16.mxu0 %v1938_v0  ;;  %p2568_p8 = scmp.ne.s32.totalorder %s2564_s4, 0  ;;  %s1848_s13 = sshll.u32 %s1942_s19, 4  ;;  %s1849_s13 = int_to_ptr.vmem [resolvable:$false] %s1848_s13 }
 0x116   : > { %s1850_s20 = scalar_lea.vmem %s1849_s13, 256  ;;  %p1851_p4 = scmp.lt.s32.totalorder %s2437_s16, %s1849_s13 }
 0x117   : > { %s2435_s28 = scalar_lea.hbm %s2567_s7, %s1404_s12 }
 0x118   : > { %1446 = vmatpush3.bf16.msra.mxu0 %v1601_v23 }
 0x119   : > { %1457 = vmatprep.subr.bf16.mxu0 %v1938_v0 }
 0x11b   : > { %1448 = vmatmul.mubr.msk.bf16.vlgmr.msra.gmra.mrb[4].mxu0 %vm662_vm1, %v638_v24 }
 0x11c   : > { %1459 = vmatprep.mubr.msk.bf16.mxu0 %vm1939_vm0, %v1938_v0 }
 0x1e5   : > { %v766_v8 = vpop.f32.mrb[0].mxu1  ;;  %v700_v13 = vpop.f32.mrb[0].mxu0 }
 0x1e6   : > { %v767_v10 = vadd.f32 %v1384_v7, %v766_v8  ;;  %v1441_v11 = vpop.f32.mrb[1].mxu1  ;;  %v701_v16 = vadd.f32 %v1380_v9, %v700_v13  ;;  %v1433_v17 = vpop.f32.mrb[1].mxu0 }
 0x1e7   : > { %v769_v12 = vpop.f32.mrb[2].mxu1  ;;  %v703_v18 = vpop.f32.mrb[2].mxu0  ;;  %v1603_v11 = vld [vmem:[%s2562_s23 + $0x8] sm:$0xff]  }
 0x1e8   : > { %v839_v14 = vpack.c.bf16 %v767_v10, %v767_v10  ;;  %v1442_v15 = vpop.f32.mrb[3].mxu1  ;;  %v838_v20 = vpack.c.bf16 %v701_v16, %v701_v16  ;;  %v1434_v21 = vpop.f32.mrb[3].mxu0 }
 0x1ea   : > { %v853_v19 = vsel %vm848_vm2, %v839_v14, 0  ;;  %959 = vrot.lane.b32.xlu0 %v839_v14, %s1940_s21 }
 0x1eb   : > { %1452 = vmatpush3.bf16.xpose.msra.mxu1 %v853_v19 }
 0x1ec   : > { %1463 = vmatprep.subr.bf16.mxu1 %v1938_v0 }
 0x1ee   : > { %956 = vrot.lane.b32.xlu0 %v838_v20, %s1940_s21  ;;  %v832_v46 = vpop.f32.mrb[4].mxu0 }
 0x1ef   : > { %v1449_v47 = vpop.f32.mrb[5].mxu0  ;;  %v833_v51 = vadd.f32 %v1388_v49, %v832_v46 }
 0x1f0   : > { %v835_v48 = vpop.f32.mrb[6].mxu0 }
 0x1f1   : > { %v1450_v50 = vpop.f32.mrb[7].mxu0  ;;  %v840_v52 = vpack.c.bf16 %v833_v51, %v833_v51 }
 0x1f2   : > { %1454 = vmatmul.mubr.msk.bf16.vlgmr.msra.gmra.mrb[4].mxu1 %vm848_vm2, %v838_v20 }
 0x1f3   : > { %1465 = vmatprep.mubr.msk.bf16.mxu1 %vm1939_vm0, %v1938_v0  ;;  %v913_v53 = vsel %vm911_vm4, %v840_v52, 0 }
 0x1f4   : > { %1458 = vmatpush3.bf16.msra.mxu0 %v913_v53 }
 0x1f5   : > { %1469 = vmatprep.subr.bf16.mxu0 %v1938_v0 }
 0x25c   : > { %v960_v25 = vpop.permute.xlu0 %959 }
 0x25d   : > { %v965_v26 = vsel %vm848_vm2, %v960_v25, 0 }
 0x25e   : > { %1464 = vmatpush3.bf16.xpose.msra.mxu1 %v965_v26 }
 0x25f   : > { %1475 = vmatprep.subr.bf16.mxu1 %v1938_v0 }
 0x260   : > { %v957_v27 = vpop.permute.xlu0 %956 }
 0x265   : > { %1466 = vmatmul.mubr.msk.bf16.vlgmr.msra.gmra.mrb[8].mxu1 %vm848_vm2, %v957_v27 }
 0x266   : > { %1479 = vmatprep.mubr.msk.bf16.mxu1 %vm1939_vm0, %v1938_v0  ;;  %1476 = vmatpush3.bf16.msra.mxu1 %v1602_v6 }
 0x267   : > { %1477 = vmatprep.subr.bf16.mxu1 %v1938_v0 }
 0x26a   : > { %1478 = vmatpush3.bf16.msra.mxu1 %v1603_v11 }
 0x2c5   : > { %v889_v29 = vpop.f32.mrb[4].mxu1 }
 0x2c6   : > { %v890_v30 = vadd.f32 %v1392_v28, %v889_v29  ;;  %v1455_v31 = vpop.f32.mrb[5].mxu1 }
 0x2c7   : > { %v892_v32 = vpop.f32.mrb[6].mxu1 }
 0x2c8   : > { %v1456_v33 = vpop.f32.mrb[7].mxu1  ;;  %v896_v34 = vsel %vm895_vm3, %v890_v30, -inf }
 0x2c9   : > { %897 = vmax.xlane.f32.xlu1 %v896_v34 }
 0x338   : > { %v1001_v35 = vpop.f32.mrb[8].mxu1 }
 0x339   : > { %v1002_v36 = vadd.f32 %v1392_v28, %v1001_v35  ;;  %v1467_v37 = vpop.f32.mrb[9].mxu1  ;;  %v1401_v35 = vld [vmem:[%s2565_s29] ss:$0 sm:$0xff] }
 0x33a   : > { %v1004_v38 = vpop.f32.mrb[10].mxu1  ;;  %v1402_v37 = vld [vmem:[%s2566_s3] ss:$0 sm:$0xff] }
 0x33b   : > { %v1468_v39 = vpop.f32.mrb[11].mxu1  ;;  %v1007_v40 = vsel %vm895_vm3, %v1002_v36, -inf }
 0x33c   : > { %1008 = vmax.xlane.f32.xlu1 %v1007_v40 }
 0x356   : > { %v898_v41 = vpop.xlane.xlu1 %897 }
 0x357   : > { %v899_v42 = vsub.f32 %v890_v30, %v898_v41 }
 0x359   : > { %v900_v43 = vmul.f32 1.442695, %v899_v42 }
 0x35b   : > { %1604 = vpow2.f32 %v900_v43 }
 0x365   : > { %v1605_v44 = vpop.eup %1604 }
 0x366   : > { %v902_v45 = vsel %vm895_vm3, %v1605_v44, 0.0 }
 0x367   : > { %903 = vadd.xlane.f32.xlu0 %v902_v45 }
 0x3c9   : > { %v1009_v54 = vpop.xlane.xlu1 %1008 }
 0x3ca   : > { %v1010_v55 = vsub.f32 %v1002_v36, %v1009_v54 }
 0x3cc   : > { %v1011_v56 = vmul.f32 1.442695, %v1010_v55 }
 0x3ce   : > { %1606 = vpow2.f32 %v1011_v56 }
 0x3d8   : > { %v1607_v57 = vpop.eup %1606 }
 0x3d9   : > { %v1013_v58 = vsel %vm895_vm3, %v1607_v57, 0.0 }
 0x3da   : > { %1014 = vadd.xlane.f32.xlu1 %v1013_v58 }
 0x3eb   : > { %1020 = vrot.lane.b32.xlu1 %v840_v52, %s1940_s21 }
 0x3f4   : > { %v904_v59 = vpop.xlane.xlu0 %903 }
 0x3f5   : > { %1608 = vrcp.f32 %v904_v59 }
 0x3ff   : > { %v1609_v60 = vpop.eup %1608 }
 0x400   : > { %v906_v61 = vmul.f32 %v1609_v60, %v1605_v44 }
 0x402   : > { %v907_v62 = vpack.c.bf16 %v906_v61, %v906_v61 }
 0x404   : > { %1460 = vmatmul.mubr.msk.bf16.vlgmr.msra.gmra.mrb[8].mxu0 %vm895_vm3, %v907_v62 }
 0x405   : > { %1471 = vmatprep.mubr.msk.bf16.mxu0 %vm1939_vm0, %v1938_v0  ;;  %v1397_v0 = vld [vmem:[%s2563_s26] ss:$0 sm:$0xff] }
 0x467   : > { %v1015_v63 = vpop.xlane.xlu1 %1014 }
 0x468   : > { %1610 = vrcp.f32 %v1015_v63 }
 0x46b   : > { %v1021_v1 = vpop.permute.xlu1 %1020 }
 0x46c   : > { %v1026_v2 = vsel %vm911_vm4, %v1021_v1, 0 }
 0x46d   : > { %1470 = vmatpush3.bf16.msra.mxu0 %v1026_v2 }
 0x472   : > { %v1611_v3 = vpop.eup %1610 }
 0x473   : > { %v1017_v4 = vmul.f32 %v1611_v3, %v1607_v57 }
 0x475   : > { %v1018_v5 = vpack.c.bf16 %v1017_v4, %v1017_v4 }
 0x477   : > { %1472 = vmatmul.mubr.msk.bf16.vlgmr.msra.gmra.mrb[12].mxu0 %vm895_vm3, %v1018_v5 }
 0x4d7   : > { %v949_v7 = vpop.f32.mrb[8].mxu0 }
 0x4d8   : > { %v1461_v8 = vpop.f32.mrb[9].mxu0 }
 0x4d9   : > { %v952_v9 = vpop.f32.mrb[10].mxu0 }
 0x4da   : > { %v1462_v10 = vpop.f32.mrb[11].mxu0 }
 0x54a   : > { %v1062_v12 = vpop.f32.mrb[12].mxu0 }
 0x54b   : > { %1069 = vrot.lane.b32.xlu1 %v1062_v12, %s1941_s18  ;;  %v1473_v13 = vpop.f32.mrb[13].mxu0  ;;  %s1844_s18 = scalar_lea.vmem %s2437_s16, 128 }
 0x54c   : > { %v1065_v14 = vpop.f32.mrb[14].mxu0  ;;  %p1845_p6 = scmp.ne.s32.totalorder %s2437_s16, %s1844_s18  ;;  %p1852_p10 = scmp.lt.s32.totalorder %s1850_s20, %s1844_s18 }
 0x54d   : > { %v1474_v15 = vpop.f32.mrb[15].mxu0 }
 0x54e   : > { %p1846_p5 = pnand %p1845_p6, %p2568_p8  ;;  %p1853_p1 = por %p1852_p10, %p1851_p4 }
 0x550   : > { %p1847_p2 = pneg %p1846_p5 }
 0x552   : > { %p1854_p13 = pnand %p1853_p1, %p1847_p2 }
 0x5bd   : > { %v1070_v16 = vpop.permute.xlu1 %1069 }
 0x5be   : > { %v1072_v17 = vsel %vm848_vm2, %v949_v7, %v1070_v16 }
 0x5bf   : > { %v1073_v18 = vpack.c.bf16 %v1072_v17, %v1072_v17 }
 0x5c1   : > { %1480 = vmatmul.mubr.msk.bf16.vlgmr.msra.gmra.mrb[12].mxu1 %vm662_vm1, %v1073_v18 }
 0x694   : > { %v1134_v19 = vpop.f32.mrb[12].mxu1 }
 0x695   : > { %v1135_v20 = vadd.f32 %v1397_v0, %v1134_v19  ;;  %v1481_v21 = vpop.f32.mrb[13].mxu1 }
 0x696   : > { %v1137_v22 = vpop.f32.mrb[14].mxu1 }
 0x697   : > { %v1482_v23 = vpop.f32.mrb[15].mxu1  ;;  %v1140_v24 = vadd.f32 %v1135_v20, %v1072_v17 }
 0x699   : > { %v1141_v25 = vsel %vm662_vm1, %v1140_v24, 0.0 }
 0x69a   : > { %1142 = vadd.xlane.f32.xlu1 %v1141_v25 }
 0x727   : > { %v1143_v26 = vpop.xlane.xlu1 %1142 }
 0x728   : > { %v1145_v27 = vmul.f32 0.03125, %v1143_v26 }
 0x72a   : > { %v1146_v28 = vsub.f32 %v1140_v24, %v1145_v27 }
 0x72c   : > { %v1147_v29 = vmul.f32 %v1146_v28, %v1146_v28 }
 0x72e   : > { %v1148_v30 = vsel %vm662_vm1, %v1147_v29, 0.0 }
 0x72f   : > { %1149 = vadd.xlane.f32.xlu0 %v1148_v30 }
 0x7bc   : > { %v1150_v31 = vpop.xlane.xlu0 %1149 }
 0x7bd   : > { %v1151_v32 = vmul.f32 0.03125, %v1150_v31 }
 0x7bf   : > { %v1152_v33 = vadd.f32 1e-12, %v1151_v32 }
 0x7c1   : > { %1612 = vrsqrt.f32 %v1152_v33 }
 0x7cb   : > { %v1613_v34 = vpop.eup %1612 }
 0x7cc   : > { %v1154_v36 = vmul.f32 %v1613_v34, %v1146_v28 }
 0x7ce   : > { %v1162_v38 = vmul.f32 %v1401_v35, %v1154_v36 }
 0x7d0   : > { %v1170_v39 = vadd.f32 %v1402_v37, %v1162_v38 }
 0x7d2   : > { %1171 = vst.msk [vmem:[%s631_s14] sm:$0xff] %vm662_vm1, %v1170_v39 }
 0x7d3   : > { %1857 = shalt.err (!%p1854_p13)
}
 0x7d4   : > { %s1858_s25 = scalar_lea.hbm %s2435_s28, 128  ;;  %s1862_s24 = scalar_lea.hbm %s2567_s7, 256 }
 0x7d5   : > { %p1859_p12 = scmp.ne.s32.totalorder %s2435_s28, %s1858_s25  ;;  %p1863_p9 = scmp.lt.u32.totalorder %s2435_s28, %s2567_s7 }
 0x7d6   : > { %p1864_p3 = scmp.lt.u32.totalorder %s1862_s24, %s1858_s25  ;;  %p1866_p6 = scmp.lt.u32.totalorder %s1858_s25, %s2435_s28 }
 0x7d7   : > { %p1860_p0 = pnand %p1859_p12, %p2568_p8 }
 0x7d8   : > { %p1865_p11 = por %p1864_p3, %p1863_p9 }
 0x7d9   : > { %p1861_p7 = pneg %p1860_p0 }
 0x7da   : > { %p1867_p5 = por %p1866_p6, %p1865_p11 }
 0x7dc   : > { %p1868_p2 = pnand %p1867_p5, %p1861_p7 }
 0x7de   : > { %1871 = shalt.err (!%p1868_p2)
}
 0x7df   : > { %1509 = dma.vmem_to_hbm [thread:$0]  (%p2568_p8), %s2437_s16, 128, %s2435_s28, %s1173_s11  }
 0x7e0 PF: > { %s2569_s1 = sld [smem:[#allocation23_spill]]  ;;  %s2570_s21 = sld [smem:[#allocation28_spill]] }
 0x7e1   : > { %s2571_s3 = sld [smem:[#allocation24_spill]] }
 0x7e6   : > { %s1198_s12 = sand.u32 1, %s2569_s1   ;;  %p2572_p4 = scmp.ne.s32.totalorder %s2570_s21, 0 }
 0x7e7   : > { %p2573_p10 = scmp.ge.s32.totalorder %s2571_s3, 2  ;;  %s1199_s14 = scalar_lea.sflag [#allocation4], %s1198_s12 }
 0x7e9   : > { %p1538_p1 = pnand %p2573_p10, %p2572_p4 }
 0x7eb   : > { %1909 = dma.done.wait (!%p1538_p1), %s1199_s14, 128  }
 0x7ec   : > { %1911 = vsyncadd (!%p1538_p1), %s1199_s14, 4294967168  ;;  %s2574_s16 = sld [smem:[#allocation25_spill]]  ;;  %s2575_s17 = sld [smem:[#allocation26_spill]] }
 0x7ed   : > { %s2576_s29 = smov %s1918_s30  ;;  %s2577_s30 = smov %s1922_s15 }
 0x7f2   : > { %p33_p13 = scmp.ge.s32.totalorder %s2574_s16, 4   ;;  %s2578_s15 = smov %s2575_s17 }
 0x7f4   :  { %35 = sbr.rel (!%p33_p13) target bundleno = 20 (0x14), region = 168 }
 0x7fb   :  { %1204 = vsyncpa [#allocation3], 1 }
 0x7fc   :  { %1206 = vsyncpa [#allocation3 + $0x1], 1 }
 0x7fd   :  { %1207 = vsyncpa [#allocation6], 1 }
 0x7fe   :  { %1209 = vsyncpa [#allocation6 + $0x1], 1 }
 0x7ff   :  { %1210 = vsyncpa [#allocation9], 1 }
 0x800   :  { %1211 = vsyncpa [#allocation12], 1 }
 0x801   :  { %1212 = vsyncpa [#allocation15], 1 }
 0x802   :  { %1213 = vsyncpa [#allocation4], 1 }
 0x803   :  { %1215 = vsyncpa [#allocation4 + $0x1], 1 }

</bundles_post_ra>
